<compile_context>
chip_gen: v6e
topology: v6e:2x2x1
jax: 0.10.0
libtpu: 0.0.40
codegen_flags: <defaults>
</compile_context>

<pallas_src>
import jax
import jax.numpy as jnp
from jax.experimental import pallas as pl
from jax.experimental.pallas import tpu as pltpu


def _round_up(x, m):
    return (x + m - 1) // m * m


def basis_vm_kernel(cxy_ref, cxz_ref, cyz_ref,
                    bxy_ref, bxz_ref, byz_ref,
                    o_ref):
    # Three small matmuls fused with the elementwise sum, accumulated in f32.
    # Bases are already transposed (and block-diagonal kron-expanded) on the
    # host.  Written as one summed expression so the compiler can fold the
    # accumulation instead of materializing two full-tile VALU adds.
    acc = (jnp.dot(cxy_ref[...], bxy_ref[...],
                   preferred_element_type=jnp.float32)
           + jnp.dot(cxz_ref[...], bxz_ref[...],
                     preferred_element_type=jnp.float32)
           + jnp.dot(cyz_ref[...], byz_ref[...],
                     preferred_element_type=jnp.float32))
    o_ref[...] = acc.astype(o_ref.dtype)


def _basis_vm_grouped(cxy, cxz, cyz, bxy, bxz, byz, *, g, rank, fdim,
                      tile_n, out_dtype):
    """Kernel path.  Inputs are the grouped coeff views [Ng, g*rank] and the
    pre-kron'd bases [g*rank, g*fdim].  Returns [Ng, g*fdim]."""
    Ng = cxy.shape[0]
    kg, fg = g * rank, g * fdim

    # ---- tile selection (grouped rows) -------------------------------------
    tile_g = _round_up(max(8, tile_n // g), 8)
    tile_g = min(tile_g, 4096)                       # v7x VMEM-safe cap
    if Ng > 8:
        # >= 2 grid steps so both v7x TensorCores get work.
        tile_g = min(tile_g, _round_up((Ng + 1) // 2, 8))
    tile_g = min(tile_g, _round_up(Ng, 8))
    grid = (pl.cdiv(Ng, tile_g),)

    # ---- explicit VMEM budget (lane-padded, double-buffered) ---------------
    bytes_per = jnp.dtype(out_dtype).itemsize
    lane = lambda d: _round_up(d, 128)
    coeff_blk = tile_g * lane(kg) * bytes_per
    out_blk = tile_g * lane(fg) * bytes_per
    basis_blk = _round_up(kg, 8) * lane(fg) * bytes_per
    vmem_needed = 2 * (3 * coeff_blk + out_blk) + 2 * 3 * basis_blk
    vmem_limit = min(int(vmem_needed * 1.25) + (1 << 20), 100 * 1024 * 1024)

    coeff_spec = pl.BlockSpec((tile_g, kg), lambda i: (i, 0))
    basis_spec = pl.BlockSpec((kg, fg), lambda i: (0, 0))   # grid-invariant
    out_spec = pl.BlockSpec((tile_g, fg), lambda i: (i, 0))

    return pl.pallas_call(
        basis_vm_kernel,
        out_shape=jax.ShapeDtypeStruct((Ng, fg), out_dtype),
        grid_spec=pltpu.PrefetchScalarGridSpec(
            num_scalar_prefetch=0,
            grid=grid,
            in_specs=[coeff_spec, coeff_spec, coeff_spec,
                      basis_spec, basis_spec, basis_spec],
            out_specs=out_spec,
        ),
        compiler_params=pltpu.CompilerParams(
            dimension_semantics=("parallel",),   # shards across TCs on v7x
            vmem_limit_bytes=vmem_limit),
    )(cxy, cxz, cyz, bxy, bxz, byz)


def basis_vm_forward(coeffs_xy_z, coeffs_xz_y, coeffs_yz_x,
                     B_XY_Z, B_XZ_Y, B_YZ_X, *, tile_n=16384):
    N, rank = coeffs_xy_z.shape
    fdim, rank_b = B_XY_Z.shape
    assert rank == rank_b
    out_dtype = coeffs_xy_z.dtype
    # TODO(synk): bf16 storage of coeffs/bases/output (f32 accumulation kept)
    # would halve HBM traffic on this bandwidth-bound kernel if numerics allow.

    # Row-group factor: pack g consecutive fdim-wide output rows into one
    # 128-lane row.  Kept at 128//fdim (no larger) to stay below the v5e
    # f32 roofline crossover.
    g = 128 // fdim if (fdim < 128 and 128 % fdim == 0) else 1

    # Pre-transposed, block-diagonal bases: kron(I_g, B.T) : [g*rank, g*fdim].
    eye_g = jnp.eye(g, dtype=B_XY_Z.dtype)
    bxy = jnp.kron(eye_g, B_XY_Z.T)
    bxz = jnp.kron(eye_g, B_XZ_Y.T)
    byz = jnp.kron(eye_g, B_YZ_X.T)

    n_main = (N // g) * g          # largest g-aligned prefix
    parts = []

    if n_main > 0:
        Ng = n_main // g
        # Contiguous prefix views + free row-major reshapes (no HBM copies).
        cxy = coeffs_xy_z[:n_main].reshape(Ng, g * rank)
        cxz = coeffs_xz_y[:n_main].reshape(Ng, g * rank)
        cyz = coeffs_yz_x[:n_main].reshape(Ng, g * rank)
        out_g = _basis_vm_grouped(cxy, cxz, cyz, bxy, bxz, byz,
                                  g=g, rank=rank, fdim=fdim,
                                  tile_n=tile_n, out_dtype=out_dtype)
        parts.append(out_g.reshape(n_main, fdim))

    if n_main < N:
        # Cold path: <= g-1 tail rows computed with a tiny plain-JAX dot
        # (avoids padding/copying the full coeff arrays on the hot path).
        tail = (coeffs_xy_z[n_main:] @ B_XY_Z.T
                + coeffs_xz_y[n_main:] @ B_XZ_Y.T
                + coeffs_yz_x[n_main:] @ B_YZ_X.T).astype(out_dtype)
        parts.append(tail)

    if len(parts) == 1:
        return parts[0]
    return jnp.concatenate(parts, axis=0)


if __name__ == "__main__":
    # Module hyper-params (small, consistent with BasisVM.__init__).
    fdim = 32     # feature dim
    rank = 10     # VM rank (module default)
    N = 256       # number of query points (rows of each coeffs tensor)

    key = jax.random.PRNGKey(0)
    k1, k2, k3, k4, k5, k6 = jax.random.split(key, 6)

    # Deterministic synthetic parameters.  The module default init_stddev=0.0
    # would zero all weights; use a nonzero stddev so the check is meaningful
    # (matches `randn(...) * init_stddev` semantics).
    init_stddev = 0.1
    B_XY_Z = jax.random.normal(k1, (fdim, rank), jnp.float32) * init_stddev
    B_XZ_Y = jax.random.normal(k2, (fdim, rank), jnp.float32) * init_stddev
    B_YZ_X = jax.random.normal(k3, (fdim, rank), jnp.float32) * init_stddev

    coeffs = {
        'xy_z': jax.random.normal(k4, (N, rank), jnp.float32),
        'xz_y': jax.random.normal(k5, (N, rank), jnp.float32),
        'yz_x': jax.random.normal(k6, (N, rank), jnp.float32),
    }

    fwd = jax.jit(basis_vm_forward, static_argnames=('tile_n',))
    out = fwd(coeffs['xy_z'], coeffs['xz_y'], coeffs['yz_x'],
              B_XY_Z, B_XZ_Y, B_YZ_X)
    out = jax.block_until_ready(out)

    # Reference (plain JAX) check of the exact PyTorch semantics.
    ref = (coeffs['xy_z'] @ B_XY_Z.T
           + coeffs['xz_y'] @ B_XZ_Y.T
           + coeffs['yz_x'] @ B_YZ_X.T)
    assert out.shape == (N, fdim)
    assert jnp.allclose(out, ref, atol=1e-5, rtol=1e-5), "mismatch vs reference"

    # TODO(synk): parameter init / save / load / logging from the PyTorch
    # module are host-side concerns and intentionally not part of the kernel.
    print("KERNEL_OK")
</pallas_src>

<mosaic_0001>
module attributes {stable_mosaic.version = 11 : i64} {
  func.func @basis_vm_kernel(%arg0: i32, %arg1: memref<32x40xf32, #tpu.memory_space<vmem>>, %arg2: memref<32x40xf32, #tpu.memory_space<vmem>>, %arg3: memref<32x40xf32, #tpu.memory_space<vmem>>, %arg4: memref<40x128xf32, #tpu.memory_space<vmem>>, %arg5: memref<40x128xf32, #tpu.memory_space<vmem>>, %arg6: memref<40x128xf32, #tpu.memory_space<vmem>>, %arg7: memref<32x128xf32, #tpu.memory_space<vmem>>) attributes {dimension_semantics = [#tpu.dimension_semantics<parallel>], iteration_bounds = array<i64: 2>, scalar_prefetch = 0 : i64, scratch_operands = 0 : i64, tpu.core_type = #tpu.core_type<tc>, window_params = [{transform_indices = @transform_0, window_bounds = array<i64: 32, 40>}, {transform_indices = @transform_1, window_bounds = array<i64: 32, 40>}, {transform_indices = @transform_2, window_bounds = array<i64: 32, 40>}, {pipeline_mode = #tpu.pipeline_mode<synchronous>, transform_indices = @transform_3, window_bounds = array<i64: 40, 128>}, {pipeline_mode = #tpu.pipeline_mode<synchronous>, transform_indices = @transform_4, window_bounds = array<i64: 40, 128>}, {pipeline_mode = #tpu.pipeline_mode<synchronous>, transform_indices = @transform_5, window_bounds = array<i64: 40, 128>}, {transform_indices = @transform_6, window_bounds = array<i64: 32, 128>}]} {
    %c0 = arith.constant 0 : index
    %c0_0 = arith.constant 0 : index
    %0 = vector.load %arg1[%c0, %c0_0] : memref<32x40xf32, #tpu.memory_space<vmem>>, vector<32x40xf32>
    %c0_1 = arith.constant 0 : index
    %c0_2 = arith.constant 0 : index
    %1 = vector.load %arg4[%c0_1, %c0_2] : memref<40x128xf32, #tpu.memory_space<vmem>>, vector<40x128xf32>
    %cst = arith.constant dense<0.000000e+00> : vector<32x128xf32>
    %2 = tpu.matmul %0, %1, %cst {dimension_numbers = #tpu.dot_dimension_numbers<[1], [0], [0], [1], [0, 0, 1, 1], [], []>} : vector<32x40xf32>, vector<40x128xf32>, vector<32x128xf32> -> vector<32x128xf32>
    %c0_3 = arith.constant 0 : index
    %c0_4 = arith.constant 0 : index
    %3 = vector.load %arg2[%c0_3, %c0_4] : memref<32x40xf32, #tpu.memory_space<vmem>>, vector<32x40xf32>
    %c0_5 = arith.constant 0 : index
    %c0_6 = arith.constant 0 : index
    %4 = vector.load %arg5[%c0_5, %c0_6] : memref<40x128xf32, #tpu.memory_space<vmem>>, vector<40x128xf32>
    %cst_7 = arith.constant dense<0.000000e+00> : vector<32x128xf32>
    %5 = tpu.matmul %3, %4, %cst_7 {dimension_numbers = #tpu.dot_dimension_numbers<[1], [0], [0], [1], [0, 0, 1, 1], [], []>} : vector<32x40xf32>, vector<40x128xf32>, vector<32x128xf32> -> vector<32x128xf32>
    %6 = arith.addf %2, %5 : vector<32x128xf32>
    %c0_8 = arith.constant 0 : index
    %c0_9 = arith.constant 0 : index
    %7 = vector.load %arg3[%c0_8, %c0_9] : memref<32x40xf32, #tpu.memory_space<vmem>>, vector<32x40xf32>
    %c0_10 = arith.constant 0 : index
    %c0_11 = arith.constant 0 : index
    %8 = vector.load %arg6[%c0_10, %c0_11] : memref<40x128xf32, #tpu.memory_space<vmem>>, vector<40x128xf32>
    %cst_12 = arith.constant dense<0.000000e+00> : vector<32x128xf32>
    %9 = tpu.matmul %7, %8, %cst_12 {dimension_numbers = #tpu.dot_dimension_numbers<[1], [0], [0], [1], [0, 0, 1, 1], [], []>} : vector<32x40xf32>, vector<40x128xf32>, vector<32x128xf32> -> vector<32x128xf32>
    %10 = arith.addf %6, %9 : vector<32x128xf32>
    %c0_13 = arith.constant 0 : index
    %c0_14 = arith.constant 0 : index
    %11 = vector.load %arg7[%c0_13, %c0_14] : memref<32x128xf32, #tpu.memory_space<vmem>>, vector<32x128xf32>
    tpu.vector_store %arg7[%c0_13, %c0_14], %10 {strides = array<i32>} : memref<32x128xf32, #tpu.memory_space<vmem>>, vector<32x128xf32>,
    return
  }
  func.func @transform_0(%arg0: i32) -> (i32, i32) {
    %c0_i32 = arith.constant 0 : i32
    %c0_i32_0 = arith.constant 0 : i32
    return %arg0, %c0_i32 : i32, i32
  }
  func.func @transform_1(%arg0: i32) -> (i32, i32) {
    %c0_i32 = arith.constant 0 : i32
    %c0_i32_0 = arith.constant 0 : i32
    return %arg0, %c0_i32 : i32, i32
  }
  func.func @transform_2(%arg0: i32) -> (i32, i32) {
    %c0_i32 = arith.constant 0 : i32
    %c0_i32_0 = arith.constant 0 : i32
    return %arg0, %c0_i32 : i32, i32
  }
  func.func @transform_3(%arg0: i32) -> (i32, i32) {
    %c0_i32 = arith.constant 0 : i32
    %c0_i32_0 = arith.constant 0 : i32
    %c0_i32_1 = arith.constant 0 : i32
    return %c0_i32, %c0_i32_0 : i32, i32
  }
  func.func @transform_4(%arg0: i32) -> (i32, i32) {
    %c0_i32 = arith.constant 0 : i32
    %c0_i32_0 = arith.constant 0 : i32
    %c0_i32_1 = arith.constant 0 : i32
    return %c0_i32, %c0_i32_0 : i32, i32
  }
  func.func @transform_5(%arg0: i32) -> (i32, i32) {
    %c0_i32 = arith.constant 0 : i32
    %c0_i32_0 = arith.constant 0 : i32
    %c0_i32_1 = arith.constant 0 : i32
    return %c0_i32, %c0_i32_0 : i32, i32
  }
  func.func @transform_6(%arg0: i32) -> (i32, i32) {
    %c0_i32 = arith.constant 0 : i32
    %c0_i32_0 = arith.constant 0 : i32
    return %arg0, %c0_i32 : i32, i32
  }
}

</mosaic_0001>

<bundles_post_ra>
// kernel: basis_vm_forward.1
= control target key start
LH: loop header
LB: loop body
LE: loop exit
PB: predicated region body
PF: predicated region fallthrough
CT: control target
= control target key end

     0   :  { %s869_s21 = smov 0   ;;  %s955_s0 = inlined_call_operand.vmem [shape: f32[64,40], index: 0, kind: input, shape index: {}]   ;;  %s956_s1 = inlined_call_operand.vmem [shape: f32[64,40], index: 1, kind: input, shape index: {}]   ;;  %s957_s2 = inlined_call_operand.vmem [shape: f32[64,40], index: 2, kind: input, shape index: {}]   ;;  %s958_s3 = inlined_call_operand.vmem [shape: f32[40,128], index: 3, kind: input, shape index: {}]   ;;  %s959_s4 = inlined_call_operand.vmem [shape: f32[40,128], index: 4, kind: input, shape index: {}]   ;;  %s960_s5 = inlined_call_operand.vmem [shape: f32[40,128], index: 5, kind: input, shape index: {}]   ;;  %s961_s6 = inlined_call_operand.vmem [shape: f32[64,128], index: 6, kind: output, shape index: {}]  }
   0x1 LB: > { %s706_s22 = sadd.s32 4294967295, %s832_s21   ;;  %p710_p0 = scmp.ge.s32.totalorder %s832_s21, 1  ;;  %s832_s21 = sphi %s869_s21, %s16_s21  }
   0x2   : > { %p235_p1 = scmp.lt.s32.totalorder %s832_s21, 3 }
   0x4   : > { %p236_p2 = pnand %p710_p0, %p235_p1 }
   0x5   : > { %s711_s29 = sshll.u32 (!%p236_p2), %s706_s22, 2 }
   0x6   : > { %239 = sbr.rel (%p236_p2) target bundleno = 236 (0xec), region = 44  ;;  %p276_p3 = scmp.lt.s32.totalorder (!%p236_p2), %s711_s29, 7 }
   0xb   : > { %v316_v0 = vld [vmem:[%s959_s4 + $0x20] sm:$0xff]  ;;  %v315_v2 = vld [vmem:[%s959_s4 + $0x18] sm:$0xff]  ;;  %v314_v4 = vld [vmem:[%s959_s4 + $0x10] sm:$0xff]  ;;  %s963_s29 = smov (!%p276_p3, %s711_s29), 7  ;;  %vm317_vm0 = vcmask 326656  }
   0xc   : > { %v307_v1 = vld [vmem:[%s958_s3 + $0x20] sm:$0xff]  ;;  %760 = vmatprep.subr.mxu0 %v316_v0  ;;  %v306_v3 = vld [vmem:[%s958_s3 + $0x18] sm:$0xff]  ;;  %v305_v5 = vld [vmem:[%s958_s3 + $0x10] sm:$0xff]  ;;  %s901_s16 = sshll.u32 %s963_s29, 3 }
   0xd   : > { %776 = vmatprep.subr.mxu1 %v307_v1  ;;  %761 = vmatpush3.msra.mxu0 %v316_v0  ;;  %v313_v6 = vld [vmem:[%s959_s4 + $0x8] sm:$0xff]  ;;  %v312_v8 = vld [vmem:[%s959_s4] sm:$0xff]  ;;  %s285_s24 = scalar_lea.vmem %s956_s1, %s901_s16  ;;  %s279_s27 = scalar_lea.vmem %s955_s0, %s901_s16  ;;  %v519_v15 = vld [vmem:[%s960_s5 + $0x18] sm:$0xff] }
   0xe   : > { %777 = vmatpush3.msra.mxu1 %v307_v1  ;;  %762 = vmatprep.subr.mxu0 %v315_v2  ;;  %v304_v7 = vld [vmem:[%s958_s3 + $0x8] sm:$0xff]  ;;  %v303_v9 = vld [vmem:[%s958_s3] sm:$0xff]  ;;  %v310_v16 = vld [vmem:[%s285_s24 + $0x10] sm:$0xff]  ;;  %s291_s14 = scalar_lea.vmem %s957_s2, %s901_s16  ;;  %s297_s20 = scalar_lea.vmem %s961_s6, %s901_s16 }
   0xf   : > { %778 = vmatprep.subr.mxu1 %v306_v3  ;;  %763 = vmatpush3.msra.mxu0 %v315_v2  ;;  %v308_v10 = vld [vmem:[%s285_s24] sm:$0xff]  ;;  %v309_v12 = vld [vmem:[%s285_s24 + $0x8] sm:$0xff]  ;;  %v301_v17 = vld [vmem:[%s279_s27 + $0x10] sm:$0xff] }
  0x10   : > { %779 = vmatpush3.msra.mxu1 %v306_v3  ;;  %764 = vmatprep.subr.mxu0 %v314_v4  ;;  %v299_v11 = vld [vmem:[%s279_s27] sm:$0xff]  ;;  %v300_v13 = vld [vmem:[%s279_s27 + $0x8] sm:$0xff]  ;;  %v311_v18 = vld [vmem:[%s285_s24 + $0x18] sm:$0xff] }
  0x11   : > { %780 = vmatprep.subr.mxu1 %v305_v5  ;;  %765 = vmatpush3.msra.mxu0 %v314_v4  ;;  %v520_v14 = vld [vmem:[%s960_s5 + $0x20] sm:$0xff]  ;;  %v302_v19 = vld [vmem:[%s279_s27 + $0x18] sm:$0xff]  ;;  %v518_v20 = vld [vmem:[%s960_s5 + $0x10] sm:$0xff] }
  0x12   : > { %781 = vmatpush3.msra.mxu1 %v305_v5  ;;  %766 = vmatprep.subr.mxu0 %v313_v6  ;;  %v517_v21 = vld [vmem:[%s960_s5 + $0x8] sm:$0xff]  ;;  %v516_v22 = vld [vmem:[%s960_s5] sm:$0xff]  ;;  %v514_v24 = vld [vmem:[%s291_s14 + $0x10] sm:$0xff] }
  0x13   : > { %782 = vmatprep.subr.mxu1 %v304_v7  ;;  %767 = vmatpush3.msra.mxu0 %v313_v6  ;;  %v512_v23 = vld [vmem:[%s291_s14] sm:$0xff]  ;;  %v513_v25 = vld [vmem:[%s291_s14 + $0x8] sm:$0xff]  ;;  %v515_v26 = vld [vmem:[%s291_s14 + $0x18] sm:$0xff] }
  0x14   : > { %783 = vmatpush3.msra.mxu1 %v304_v7  ;;  %768 = vmatprep.subr.mxu0 %v312_v8 }
  0x15   : > { %784 = vmatprep.subr.mxu1 %v303_v9  ;;  %769 = vmatpush3.msra.mxu0 %v312_v8 }
  0x16   : > { %770 = vmatprep.mubr.msk.f32.mxu0 %vm317_vm0, %v308_v10  ;;  %785 = vmatpush3.msra.mxu1 %v303_v9 }
  0x17   : > { %786 = vmatprep.mubr.msk.f32.mxu1 %vm317_vm0, %v299_v11  ;;  %771 = vmatmul.mubr.msk.f32.vlgmr.msra.gmra.mxu0 %vm317_vm0, %v309_v12 }
  0x18   : > { %787 = vmatmul.mubr.msk.f32.vlgmr.msra.gmra.mxu1 %vm317_vm0, %v300_v13  ;;  %792 = vmatprep.subr.mxu0 %v520_v14 }
  0x19   : > { %808 = vmatprep.subr.mxu1 %v520_v14  ;;  %793 = vmatpush3.msra.mxu0 %v520_v14 }
  0x1a   : > { %813 = vmatpush3.msra.mxu1 %v520_v14  ;;  %794 = vmatprep.subr.mxu0 %v519_v15 }
  0x1b   : > { %809 = vmatprep.subr.mxu1 %v519_v15  ;;  %773 = vmatprep.mubr.msk.f32.mxu0 %vm317_vm0, %v310_v16 }
  0x1c   : > { %789 = vmatprep.mubr.msk.f32.mxu1 %vm317_vm0, %v301_v17  ;;  %795 = vmatpush3.msra.mxu0 %v519_v15 }
  0x1d   : > { %814 = vmatpush3.msra.mxu1 %v519_v15  ;;  %774 = vmatmul.mubr.msk.f32.gmra.mxu0 %vm317_vm0, %v311_v18 }
  0x1e   : > { %790 = vmatmul.mubr.msk.f32.gmra.mxu1 %vm317_vm0, %v302_v19  ;;  %796 = vmatprep.subr.mxu0 %v518_v20 }
  0x1f   : > { %810 = vmatprep.subr.mxu1 %v518_v20  ;;  %797 = vmatpush3.msra.mxu0 %v518_v20 }
  0x20   : > { %815 = vmatpush3.msra.mxu1 %v518_v20  ;;  %798 = vmatprep.subr.mxu0 %v517_v21 }
  0x21   : > { %811 = vmatprep.subr.mxu1 %v517_v21  ;;  %799 = vmatpush3.msra.mxu0 %v517_v21 }
  0x22   : > { %816 = vmatpush3.msra.mxu1 %v517_v21  ;;  %800 = vmatprep.subr.mxu0 %v516_v22 }
  0x23   : > { %812 = vmatprep.subr.mxu1 %v516_v22  ;;  %801 = vmatpush3.msra.mxu0 %v516_v22 }
  0x24   : > { %817 = vmatpush3.msra.mxu1 %v516_v22  ;;  %802 = vmatprep.mubr.msk.f32.mxu0 %vm317_vm0, %v512_v23 }
  0x25   : > { %805 = vmatprep.mubr.msk.f32.mxu1 %vm317_vm0, %v514_v24  ;;  %803 = vmatmul.mubr.msk.f32.vlgmr.msra.gmra.mxu0 %vm317_vm0, %v513_v25 }
  0x26   : > { %806 = vmatmul.mubr.msk.f32.vlgmr.msra.gmra.mxu1 %vm317_vm0, %v515_v26 }
  0xd7   : > { %v772_v27 = vpop.f32.mrf.mxu0 }
  0xd8   : > { %v788_v28 = vpop.f32.mrf.mxu1 }
  0xd9   : > { %v396_v29 = vpop.f32.mrf.mxu0  ;;  %v499_v38 = vadd.f32 %v788_v28, %v772_v27 }
  0xda   : > { %v493_v30 = vpop.f32.mrf.mxu1 }
  0xdb   : > { %v494_v37 = vadd.f32 %v493_v30, %v396_v29 }
  0xdd   : > { %v775_v31 = vpop.f32.mrf.mxu0 }
  0xde   : > { %v791_v32 = vpop.f32.mrf.mxu1 }
  0xdf   : > { %v406_v33 = vpop.f32.mrf.mxu0  ;;  %v509_v43 = vadd.f32 %v791_v32, %v775_v31 }
  0xe0   : > { %v503_v34 = vpop.f32.mrf.mxu1 }
  0xe1   : > { %v504_v41 = vadd.f32 %v503_v34, %v406_v33 }
  0xe5   : > { %v804_v35 = vpop.f32.mrf.mxu0 }
  0xe6   : > { %v807_v36 = vpop.f32.mrf.mxu1  ;;  %v619_v44 = vadd.f32 %v804_v35, %v499_v38 }
  0xe7   : > { %v599_v39 = vpop.f32.mrf.mxu0  ;;  %v621_v46 = vadd.f32 %v807_v36, %v509_v43 }
  0xe8   : > { %v609_v40 = vpop.f32.mrf.mxu1  ;;  %v618_v42 = vadd.f32 %v599_v39, %v494_v37  ;;  %623 = vst [vmem:[%s297_s20 + $0x8] sm:$0xff] %v619_v44 }
  0xe9   : > { %v620_v45 = vadd.f32 %v609_v40, %v504_v41  ;;  %625 = vst [vmem:[%s297_s20 + $0x18] sm:$0xff] %v621_v46 }
  0xea   : > { %622 = vst [vmem:[%s297_s20] sm:$0xff] %v618_v42 }
  0xeb   : > { %624 = vst [vmem:[%s297_s20 + $0x10] sm:$0xff] %v620_v45 }
  0xec PF: > { %s16_s21 = sadd.s32 1, %s832_s21  }
  0xed   : > { %p13_p4 = scmp.ge.s32.totalorder %s16_s21, 4  }
  0xef   :  { %15 = sbr.rel (!%p13_p4) target bundleno = 1 (0x1), region = 80 }

</bundles_post_ra>
